<compile_context>
chip_gen: v5e
topology: v5e:2x2
jax: 0.10.0
libtpu: 0.0.40
codegen_flags: <defaults>
</compile_context>

<pallas_src>
from functools import partial

import jax
import jax.numpy as jnp
from jax.experimental import pallas as pl
from jax.experimental.pallas import tpu as pltpu


def _round_up(x, m):
    return ((x + m - 1) // m) * m


def _pad_and_tile(dim, tile, align):
    """Return (padded_dim, tile_size) with padded_dim % tile_size == 0."""
    if dim <= tile:
        p = _round_up(dim, align)
        return p, p
    return _round_up(dim, tile), tile


# --------------------------------------------------------------------------
# Pallas kernel 1: Yr = Re{(Xr + i Xi) @ (Wr + i Wi)} = Xr@Wr - Xi@Wi
#   bf16 inputs, f32 accumulation directly into the VMEM-resident output
#   block (no scratch accumulator, no epilogue copy).  Grid = (M, L, K) tiles
#   with K (the reduction) last; M/L tiles are "parallel" for megacore.
# --------------------------------------------------------------------------
def _synth_kernel(xr_ref, xi_ref, wr_ref, wi_ref, y_ref):
    @pl.when(pl.program_id(2) == 0)
    def _():
        y_ref[...] = jnp.zeros_like(y_ref)

    y_ref[...] += (
        jnp.dot(xr_ref[...], wr_ref[...], preferred_element_type=jnp.float32)
        - jnp.dot(xi_ref[...], wi_ref[...], preferred_element_type=jnp.float32))


def real_synthesis_matmul(xr, xi, wr, wi, *, tm, tn, tk):
    Mp, Kp = xr.shape
    _, Lp = wr.shape
    assert Mp % tm == 0 and Kp % tk == 0 and Lp % tn == 0
    return pl.pallas_call(
        _synth_kernel,
        out_shape=jax.ShapeDtypeStruct((Mp, Lp), jnp.float32),
        grid_spec=pltpu.PrefetchScalarGridSpec(
            num_scalar_prefetch=0,
            grid=(Mp // tm, Lp // tn, Kp // tk),        # reduction axis last
            in_specs=[
                pl.BlockSpec((tm, tk), lambda i, j, k: (i, k)),
                pl.BlockSpec((tm, tk), lambda i, j, k: (i, k)),
                pl.BlockSpec((tk, tn), lambda i, j, k: (k, j)),
                pl.BlockSpec((tk, tn), lambda i, j, k: (k, j)),
            ],
            out_specs=pl.BlockSpec((tm, tn), lambda i, j, k: (i, j)),
        ),
        compiler_params=pltpu.CompilerParams(
            dimension_semantics=("parallel", "parallel", "arbitrary")),
    )(xr, xi, wr, wi)


# --------------------------------------------------------------------------
# Pallas kernel 2: overlap-add of slice signals (S_pad, BCp, L) -> (BCp, T)
#   Several slices per grid step (amortizes the ~0.35us/step overhead);
#   BC is padded to 8 sublanes and L / hop are lane-aligned so every store is
#   an unmasked full-tile vst.
# TODO(synk): for full-song lengths tile T instead of keeping (BCp, T)
#   resident in VMEM (needed on v7x's 64 MiB VMEM).
# --------------------------------------------------------------------------
def _ola_kernel(hop, slices_per_step, slc_ref, out_ref):
    blk = pl.program_id(0)

    @pl.when(blk == 0)
    def _():
        out_ref[...] = jnp.zeros_like(out_ref)

    L = slc_ref.shape[-1]
    for r in range(slices_per_step):
        start = pl.multiple_of((blk * slices_per_step + r) * hop, 128)
        out_ref[:, pl.ds(start, L)] += slc_ref[r]


def overlap_add_pallas(slices, hop, *, slices_per_step):
    S_pad, BCp, Lp = slices.shape
    assert S_pad % slices_per_step == 0 and BCp % 8 == 0
    assert Lp % 128 == 0 and hop % 128 == 0
    T = (S_pad - 1) * hop + Lp
    return pl.pallas_call(
        partial(_ola_kernel, hop, slices_per_step),
        out_shape=jax.ShapeDtypeStruct((BCp, T), jnp.float32),
        grid_spec=pltpu.PrefetchScalarGridSpec(
            num_scalar_prefetch=0,
            grid=(S_pad // slices_per_step,),
            in_specs=[pl.BlockSpec((slices_per_step, BCp, Lp),
                                   lambda s: (s, 0, 0))],
            out_specs=pl.BlockSpec((BCp, T), lambda s: (0, 0)),
        ),
        compiler_params=pltpu.CompilerParams(
            dimension_semantics=("arbitrary",)),
    )(slices)


def overlap_add_fallback(slices, hop, T):
    # TODO(synk): non-lane-aligned hop -> XLA scatter-add fallback.
    S, BC, L = slices.shape
    out = jnp.zeros((BC, T), jnp.float32)
    for s in range(S):
        out = out.at[:, s * hop:s * hop + L].add(slices[s])
    return out


# --------------------------------------------------------------------------
# Deterministic synthesis operator (stands in for the nsgt dual-frame atoms).
#   W[b, m, t] = hann(t - center_m) * exp(2*pi*i*(f_offset + b)*t / L) / frames
# --------------------------------------------------------------------------
def make_synthesis_matrix(bins, frames, slice_len, f_offset):
    t = jnp.arange(slice_len, dtype=jnp.float32)[None, None, :]
    b = jnp.arange(bins, dtype=jnp.float32)[:, None, None]
    m = jnp.arange(frames, dtype=jnp.float32)[None, :, None]
    centers = (m + 0.5) * slice_len / frames
    arg = jnp.clip((t - centers) / (slice_len / frames) * jnp.pi,
                   -jnp.pi, jnp.pi)
    env = 0.5 * (1.0 + jnp.cos(arg))
    phase = 2.0 * jnp.pi * (f_offset + b) * t / slice_len
    wr = (env * jnp.cos(phase) / frames).astype(jnp.float32)
    wi = (env * jnp.sin(phase) / frames).astype(jnp.float32)
    return wr, wi  # (bins, frames, slice_len)


# --------------------------------------------------------------------------
# ISliCQT: same forward semantics as the PyTorch module.
# --------------------------------------------------------------------------
class ISliCQTPallas:
    def __init__(self, bucket_bins_frames, slice_len, hop, *,
                 tm=256, tn=512, tk=512, ola_slices_per_step=8):
        self.slice_len = slice_len
        self.hop = hop
        self.ola_slices_per_step = ola_slices_per_step
        self.tm_target = tm

        wrs, wis = [], []
        f_offset = 1.0
        for bins, frames in bucket_bins_frames:
            wr, wi = make_synthesis_matrix(bins, frames, slice_len, f_offset)
            f_offset += float(bins)
            wrs.append(wr.reshape(bins * frames, slice_len))
            wis.append(wi.reshape(bins * frames, slice_len))
        wr = jnp.concatenate(wrs, axis=0)   # (K, L) f32
        wi = jnp.concatenate(wis, axis=0)
        K, L = wr.shape
        self.K = K

        # Static padding + bf16 cast of the synthesis operator, hoisted out of
        # __call__ (W is constant across calls).
        self.Kp, self.tk = _pad_and_tile(K, tk, 128)
        self.Lp, self.tn = _pad_and_tile(L, tn, 128)
        self.L128 = _round_up(L, 128)        # lane-aligned slice width for OLA
        self.wr = jnp.pad(wr, ((0, self.Kp - K), (0, self.Lp - L))
                          ).astype(jnp.bfloat16)
        self.wi = jnp.pad(wi, ((0, self.Kp - K), (0, self.Lp - L))
                          ).astype(jnp.bfloat16)

    def __call__(self, X_list, length):
        parts_r, parts_i = [], []
        shape = None
        S = BC = None
        for X in X_list:
            Xshape = X.ndim                       # before view_as_complex
            Xr, Xi = X[..., 0], X[..., 1]         # view_as_complex
            shape = Xr.shape                      # complex-view shape
            if Xshape == 6:
                new = (shape[0] * shape[1],) + shape[2:]
            else:                                 # 7-dim (targets) variant
                new = (shape[0] * shape[1] * shape[2],) + shape[3:]
            Xr = jnp.moveaxis(Xr.reshape(new), -2, 0)   # (S, BC, bins, frames)
            Xi = jnp.moveaxis(Xi.reshape(new), -2, 0)
            S, BC = Xr.shape[0], Xr.shape[1]
            parts_r.append(Xr.reshape(S * BC, -1))
            parts_i.append(Xi.reshape(S * BC, -1))
        xr = jnp.concatenate(parts_r, axis=-1)    # (M, K)
        xi = jnp.concatenate(parts_i, axis=-1)

        M, K = xr.shape
        assert K == self.K
        Mp, tm = _pad_and_tile(M, self.tm_target, 16)   # bf16 sublane packing
        xr = jnp.pad(xr, ((0, Mp - M), (0, self.Kp - K))).astype(jnp.bfloat16)
        xi = jnp.pad(xi, ((0, Mp - M), (0, self.Kp - K))).astype(jnp.bfloat16)

        # Real part of the slice-synthesis (inverse transform is real).
        yr = real_synthesis_matmul(xr, xi, self.wr, self.wi,
                                   tm=tm, tn=self.tn, tk=self.tk)
        slices = yr[:M, :self.L128].reshape(S, BC, self.L128)

        hop = self.hop
        if hop % 128 == 0:
            SB = min(self.ola_slices_per_step, S)
            S_pad = _round_up(S, SB)
            BCp = _round_up(BC, 8)
            slices = jnp.pad(slices, ((0, S_pad - S), (0, BCp - BC), (0, 0)))
            y = overlap_add_pallas(slices, hop, slices_per_step=SB)[:BC]
        else:
            T_fb = (S - 1) * hop + self.L128
            y = overlap_add_fallback(slices, hop, T_fb)

        T = y.shape[-1]
        if length <= T:
            y = y[:, :length]
        else:
            y = jnp.pad(y, ((0, 0), (0, length - T)))

        # y.view(*shape[:-3], -1)
        return y.reshape(*shape[:-3], length)


if __name__ == "__main__":
    key = jax.random.PRNGKey(0)
    nb_samples, nb_channels, nb_slices = 2, 2, 3
    slice_len, hop = 256, 128
    buckets = [(3, 8), (5, 16)]   # (nb_bins_i, nb_frames_i) per ragged bucket

    X_list = []
    for bins, frames in buckets:
        key, sub = jax.random.split(key)
        X_list.append(jax.random.normal(
            sub,
            (nb_samples, nb_channels, bins, nb_slices, frames, 2),
            dtype=jnp.float32))

    length = 400
    model = ISliCQTPallas(buckets, slice_len, hop)
    y = jax.block_until_ready(model(X_list, length))
    assert y.shape == (nb_samples, nb_channels, length), y.shape
    assert jnp.all(jnp.isfinite(y))

    # Pure-JAX reference (f32 matmul + scatter-add overlap-add); the Pallas
    # path uses bf16 inputs, so allow a small relative error budget.
    def reference(X_list, length):
        pr, pi = [], []
        for X in X_list:
            Xr, Xi = X[..., 0], X[..., 1]
            shp = Xr.shape
            new = (shp[0] * shp[1],) + shp[2:]
            Xr = jnp.moveaxis(Xr.reshape(new), -2, 0)
            Xi = jnp.moveaxis(Xi.reshape(new), -2, 0)
            S, BC = Xr.shape[0], Xr.shape[1]
            pr.append(Xr.reshape(S * BC, -1))
            pi.append(Xi.reshape(S * BC, -1))
        xr = jnp.concatenate(pr, -1)
        xi = jnp.concatenate(pi, -1)
        K = xr.shape[1]
        wr = model.wr.astype(jnp.float32)[:K, :slice_len]
        wi = model.wi.astype(jnp.float32)[:K, :slice_len]
        hi = jax.lax.Precision.HIGHEST
        yr = jnp.dot(xr, wr, precision=hi) - jnp.dot(xi, wi, precision=hi)
        sl = yr.reshape(S, BC, slice_len)
        T = (S - 1) * hop + slice_len
        out = jnp.zeros((BC, T), jnp.float32)
        for s in range(S):
            out = out.at[:, s * hop:s * hop + slice_len].add(sl[s])
        return out[:, :length].reshape(nb_samples, nb_channels, length)

    y_ref = jax.block_until_ready(reference(X_list, length))
    err = float(jnp.max(jnp.abs(y - y_ref)))
    scale = float(jnp.max(jnp.abs(y_ref))) + 1e-6
    assert err <= 5e-2 * scale, (err, scale)
    print("KERNEL_OK")
</pallas_src>

<mosaic_0001>
module attributes {stable_mosaic.version = 11 : i64} {
  func.func @_synth_kernel(%arg0: i32, %arg1: i32, %arg2: i32, %arg3: memref<16x128xbf16, #tpu.memory_space<vmem>>, %arg4: memref<16x128xbf16, #tpu.memory_space<vmem>>, %arg5: memref<128x256xbf16, #tpu.memory_space<vmem>>, %arg6: memref<128x256xbf16, #tpu.memory_space<vmem>>, %arg7: memref<16x256xf32, #tpu.memory_space<vmem>>) attributes {dimension_semantics = [#tpu.dimension_semantics<parallel>, #tpu.dimension_semantics<parallel>, #tpu.dimension_semantics<arbitrary>], iteration_bounds = array<i64: 1, 1, 1>, scalar_prefetch = 0 : i64, scratch_operands = 0 : i64, tpu.core_type = #tpu.core_type<tc>, window_params = [{transform_indices = @transform_0, window_bounds = array<i64: 16, 128>}, {transform_indices = @transform_1, window_bounds = array<i64: 16, 128>}, {transform_indices = @transform_2, window_bounds = array<i64: 128, 256>}, {transform_indices = @transform_3, window_bounds = array<i64: 128, 256>}, {transform_indices = @transform_4, window_bounds = array<i64: 16, 256>}]} {
    %c0_i32 = arith.constant 0 : i32
    %0 = arith.cmpi eq, %arg2, %c0_i32 : i32
    %1 = arith.extui %0 : i1 to i32
    %c0_i32_0 = arith.constant 0 : i32
    %2 = arith.cmpi ne, %1, %c0_i32_0 : i32
    scf.if %2 {
      %cst_13 = arith.constant 0.000000e+00 : f32
      %13 = vector.broadcast %cst_13 : f32 to vector<16x256xf32>
      %c0_14 = arith.constant 0 : index
      %c0_15 = arith.constant 0 : index
      %14 = vector.load %arg7[%c0_14, %c0_15] : memref<16x256xf32, #tpu.memory_space<vmem>>, vector<16x256xf32>
      tpu.vector_store %arg7[%c0_14, %c0_15], %13 {strides = array<i32>} : memref<16x256xf32, #tpu.memory_space<vmem>>, vector<16x256xf32>,
    } else {
    }
    %c0 = arith.constant 0 : index
    %c0_1 = arith.constant 0 : index
    %3 = vector.load %arg7[%c0, %c0_1] : memref<16x256xf32, #tpu.memory_space<vmem>>, vector<16x256xf32>
    %c0_2 = arith.constant 0 : index
    %c0_3 = arith.constant 0 : index
    %4 = vector.load %arg3[%c0_2, %c0_3] : memref<16x128xbf16, #tpu.memory_space<vmem>>, vector<16x128xbf16>
    %c0_4 = arith.constant 0 : index
    %c0_5 = arith.constant 0 : index
    %5 = vector.load %arg5[%c0_4, %c0_5] : memref<128x256xbf16, #tpu.memory_space<vmem>>, vector<128x256xbf16>
    %cst = arith.constant dense<0.000000e+00> : vector<16x256xf32>
    %6 = tpu.matmul %4, %5, %cst {dimension_numbers = #tpu.dot_dimension_numbers<[1], [0], [0], [1], [0, 0, 1, 1], [], []>} : vector<16x128xbf16>, vector<128x256xbf16>, vector<16x256xf32> -> vector<16x256xf32>
    %c0_6 = arith.constant 0 : index
    %c0_7 = arith.constant 0 : index
    %7 = vector.load %arg4[%c0_6, %c0_7] : memref<16x128xbf16, #tpu.memory_space<vmem>>, vector<16x128xbf16>
    %c0_8 = arith.constant 0 : index
    %c0_9 = arith.constant 0 : index
    %8 = vector.load %arg6[%c0_8, %c0_9] : memref<128x256xbf16, #tpu.memory_space<vmem>>, vector<128x256xbf16>
    %cst_10 = arith.constant dense<0.000000e+00> : vector<16x256xf32>
    %9 = tpu.matmul %7, %8, %cst_10 {dimension_numbers = #tpu.dot_dimension_numbers<[1], [0], [0], [1], [0, 0, 1, 1], [], []>} : vector<16x128xbf16>, vector<128x256xbf16>, vector<16x256xf32> -> vector<16x256xf32>
    %10 = arith.subf %6, %9 : vector<16x256xf32>
    %11 = arith.addf %3, %10 : vector<16x256xf32>
    %c0_11 = arith.constant 0 : index
    %c0_12 = arith.constant 0 : index
    %12 = vector.load %arg7[%c0_11, %c0_12] : memref<16x256xf32, #tpu.memory_space<vmem>>, vector<16x256xf32>
    tpu.vector_store %arg7[%c0_11, %c0_12], %11 {strides = array<i32>} : memref<16x256xf32, #tpu.memory_space<vmem>>, vector<16x256xf32>,
    return
  }
  func.func @transform_0(%arg0: i32, %arg1: i32, %arg2: i32) -> (i32, i32) {
    %c0_i32 = arith.constant 0 : i32
    return %arg0, %arg2 : i32, i32
  }
  func.func @transform_1(%arg0: i32, %arg1: i32, %arg2: i32) -> (i32, i32) {
    %c0_i32 = arith.constant 0 : i32
    return %arg0, %arg2 : i32, i32
  }
  func.func @transform_2(%arg0: i32, %arg1: i32, %arg2: i32) -> (i32, i32) {
    %c0_i32 = arith.constant 0 : i32
    return %arg2, %arg1 : i32, i32
  }
  func.func @transform_3(%arg0: i32, %arg1: i32, %arg2: i32) -> (i32, i32) {
    %c0_i32 = arith.constant 0 : i32
    return %arg2, %arg1 : i32, i32
  }
  func.func @transform_4(%arg0: i32, %arg1: i32, %arg2: i32) -> (i32, i32) {
    %c0_i32 = arith.constant 0 : i32
    return %arg0, %arg1 : i32, i32
  }
}

</mosaic_0001>

<bundles_post_ra>
// kernel: tpu_custom_call.1
= control target key start
LH: loop header
LB: loop body
LE: loop exit
PB: predicated region body
PF: predicated region fallthrough
CT: control target
= control target key end

     0   :  { %9 = vsyncpa [#allocation3], 0  ;;  %s751_s0 = inlined_call_operand.hbm [shape: bf16[16,128], index: 0, kind: input, shape index: {}]   ;;  %s752_s1 = inlined_call_operand.hbm [shape: bf16[16,128], index: 1, kind: input, shape index: {}]   ;;  %s753_s2 = inlined_call_operand.hbm [shape: bf16[128,256], index: 2, kind: input, shape index: {}]   ;;  %s754_s3 = inlined_call_operand.hbm [shape: bf16[128,256], index: 3, kind: input, shape index: {}]   ;;  %s755_s4 = inlined_call_operand.hbm [shape: f32[16,256], index: 4, kind: output, shape index: {}]  }
   0x1   :  { %10 = vsyncpa [#allocation6], 0 }
   0x2   :  { %11 = vsyncpa [#allocation9], 0 }
   0x3   :  { %12 = vsyncpa [#allocation4], 0  ;;  %s30_s17 = sshll.u32 %s752_s1, 4  ;;  %s700_s18 = smov [#allocation5]   ;;  %s31_s17 = int_to_ptr.hbm [resolvable:$true] %s30_s17 }
   0x4   :  { %s32_s19 = sshll.u32 %s700_s18, 4  ;;  %s17_s22 = sshll.u32 %s751_s0, 4  ;;  %s33_s19 = int_to_ptr.vmem [resolvable:$true] %s32_s19  ;;  %s18_s22 = int_to_ptr.hbm [resolvable:$true] %s17_s22 }
   0x5   :  { %s701_s23 = smov 64   ;;  %s702_s24 = smov 4  }
   0x6   :  { %38 = dma.hbm_to_vmem [thread:$0]  %s31_s17, 128, %s33_s19, [#allocation6], %s701_s23, %s701_s23, %s702_s24  }
   0x7   :  { %s703_s25 = smov [#allocation2]   ;;  %s43_s29 = sshll.u32 %s753_s2, 4  ;;  %s44_s29 = int_to_ptr.hbm [resolvable:$true] %s43_s29 }
   0x8   :  { %s19_s26 = sshll.u32 %s703_s25, 4  ;;  %s704_s1 = smov [#allocation7]   ;;  %s20_s26 = int_to_ptr.vmem [resolvable:$true] %s19_s26 }
   0x9   :  { %25 = dma.hbm_to_vmem [thread:$0]  %s18_s22, 128, %s20_s26, [#allocation3], %s701_s23, %s701_s23, %s702_s24  }
   0xa   :  { %s45_s30 = sshll.u32 %s704_s1, 4  ;;  %s56_s0 = sshll.u32 %s754_s3, 4  ;;  %s46_s30 = int_to_ptr.vmem [resolvable:$true] %s45_s30  ;;  %s57_s0 = int_to_ptr.hbm [resolvable:$true] %s56_s0 }
   0xb   :  { %s705_s7 = smov 128   ;;  %s706_s8 = smov 8  }
   0xc   :  { %51 = dma.hbm_to_vmem [thread:$0]  %s44_s29, 2048, %s46_s30, [#allocation6], %s705_s7, %s705_s7, %s706_s8  }
   0xd   :  { %s707_s9 = smov [#allocation8]  }
   0xe   :  { %s58_s10 = sshll.u32 %s707_s9, 4  ;;  %s59_s10 = int_to_ptr.vmem [resolvable:$true] %s58_s10 }
   0xf   :  { %64 = dma.hbm_to_vmem [thread:$0]  %s57_s0, 2048, %s59_s10, [#allocation9], %s705_s7, %s705_s7, %s706_s8  }
  0x10   :  { %692 = dma.done.wait [#allocation3], 128  }
  0x11   :  { %693 = vsyncadd [#allocation3], 4294967168 }
  0x12   :  { %694 = dma.done.wait [#allocation6], 2176  }
  0x13   :  { %695 = vsyncadd [#allocation6], 4294965120 }
  0x14   :  { %696 = dma.done.wait [#allocation9], 2048  }
  0x15   :  { %697 = vsyncadd [#allocation9], 4294965248  ;;  %v452_v0 = vld [vmem:[#allocation7 + $0x70] sm:$0xf]  ;;  %v542_v1 = vld [vmem:[#allocation7 + $0x74] sm:$0xf0] }
  0x16   :  { %v541_v2 = vld [vmem:[#allocation7 + $0x74] sm:$0xf]  ;;  %v453_v3 = vor.u32 %v542_v1, %v452_v0  ;;  %v454_v4 = vld [vmem:[#allocation7 + $0x78] sm:$0xf0]  ;;  %v520_v5 = vld [vmem:[#allocation8 + $0x70] sm:$0xf] }
  0x17   :  { %v559_v6 = vld [vmem:[#allocation8 + $0x74] sm:$0xf0]  ;;  %v457_v7 = vor.u32 %v541_v2, %v454_v4  ;;  %v558_v9 = vld [vmem:[#allocation8 + $0x74] sm:$0xf]  ;;  %v522_v10 = vld [vmem:[#allocation8 + $0x78] sm:$0xf0] }
  0x18   :  { %v521_v8 = vor.u32 %v559_v6, %v520_v5  ;;  %v444_v11 = vld [vmem:[#allocation7 + $0x60] sm:$0xf]  ;;  %197 = vmatpush.bf16.msra.mxu0 %v453_v3  ;;  %v525_v12 = vor.u32 %v558_v9, %v522_v10  ;;  %v540_v13 = vld [vmem:[#allocation7 + $0x64] sm:$0xf0]  ;;  %v539_v14 = vld [vmem:[#allocation7 + $0x64] sm:$0xf] }
  0x19   :  { %v446_v15 = vld [vmem:[#allocation7 + $0x68] sm:$0xf0]  ;;  %211 = vmatpush.bf16.msra.mxu1 %v457_v7  ;;  %v445_v16 = vor.u32 %v540_v13, %v444_v11  ;;  %v512_v18 = vld [vmem:[#allocation8 + $0x60] sm:$0xf]  ;;  %v557_v19 = vld [vmem:[#allocation8 + $0x64] sm:$0xf0] }
  0x1a   :  { %329 = vmatpush.bf16.msra.mxu2 %v521_v8  ;;  %v449_v17 = vor.u32 %v539_v14, %v446_v15  ;;  %v556_v20 = vld [vmem:[#allocation8 + $0x64] sm:$0xf]  ;;  %343 = vmatpush.bf16.msra.mxu3 %v525_v12  ;;  %v513_v21 = vor.u32 %v557_v19, %v512_v18  ;;  %v514_v22 = vld [vmem:[#allocation8 + $0x68] sm:$0xf0]  ;;  %v436_v23 = vld [vmem:[#allocation7 + $0x50] sm:$0xf] }
  0x1b   :  { %v538_v24 = vld [vmem:[#allocation7 + $0x54] sm:$0xf0]  ;;  %v517_v25 = vor.u32 %v556_v20, %v514_v22  ;;  %v537_v26 = vld [vmem:[#allocation7 + $0x54] sm:$0xf]  ;;  %v438_v27 = vld [vmem:[#allocation7 + $0x58] sm:$0xf0] }
  0x1c   :  { %v504_v28 = vld [vmem:[#allocation8 + $0x50] sm:$0xf]  ;;  %198 = vmatpush.bf16.msra.mxu0 %v445_v16  ;;  %v437_v29 = vor.u32 %v538_v24, %v436_v23  ;;  %v555_v30 = vld [vmem:[#allocation8 + $0x54] sm:$0xf0]  ;;  %v554_v31 = vld [vmem:[#allocation8 + $0x54] sm:$0xf]  ;;  %v441_v33 = vor.u32 %v537_v26, %v438_v27 }
  0x1d   :  { %v506_v32 = vld [vmem:[#allocation8 + $0x58] sm:$0xf0]  ;;  %212 = vmatpush.bf16.msra.mxu1 %v449_v17  ;;  %v505_v34 = vor.u32 %v555_v30, %v504_v28  ;;  %v428_v35 = vld [vmem:[#allocation7 + $0x40] sm:$0xf]  ;;  %v536_v36 = vld [vmem:[#allocation7 + $0x44] sm:$0xf0] }
  0x1e   :  { %330 = vmatpush.bf16.msra.mxu2 %v513_v21  ;;  %v535_v37 = vld [vmem:[#allocation7 + $0x44] sm:$0xf]  ;;  %344 = vmatpush.bf16.msra.mxu3 %v517_v25  ;;  %v509_v38 = vor.u32 %v554_v31, %v506_v32  ;;  %v430_v39 = vld [vmem:[#allocation7 + $0x48] sm:$0xf0]  ;;  %v496_v40 = vld [vmem:[#allocation8 + $0x40] sm:$0xf]  ;;  %v429_v44 = vor.u32 %v536_v36, %v428_v35 }
  0x1f   :  { %v553_v41 = vld [vmem:[#allocation8 + $0x44] sm:$0xf0]  ;;  %v552_v42 = vld [vmem:[#allocation8 + $0x44] sm:$0xf]  ;;  %v498_v43 = vld [vmem:[#allocation8 + $0x48] sm:$0xf0]  ;;  %v433_v45 = vor.u32 %v535_v37, %v430_v39 }
  0x20   :  { %199 = vmatpush.bf16.msra.mxu0 %v437_v29  ;;  %v497_v46 = vor.u32 %v553_v41, %v496_v40  ;;  %v420_v47 = vld [vmem:[#allocation7 + $0x30] sm:$0xf]  ;;  %v534_v48 = vld [vmem:[#allocation7 + $0x34] sm:$0xf0]  ;;  %v533_v49 = vld [vmem:[#allocation7 + $0x34] sm:$0xf]  ;;  %v501_v50 = vor.u32 %v552_v42, %v498_v43 }
  0x21   :  { %213 = vmatpush.bf16.msra.mxu1 %v441_v33  ;;  %v422_v51 = vld [vmem:[#allocation7 + $0x38] sm:$0xf0]  ;;  %v488_v52 = vld [vmem:[#allocation8 + $0x30] sm:$0xf]  ;;  %v551_v53 = vld [vmem:[#allocation8 + $0x34] sm:$0xf0]  ;;  %v421_v56 = vor.u32 %v534_v48, %v420_v47 }
  0x22   :  { %331 = vmatpush.bf16.msra.mxu2 %v505_v34  ;;  %345 = vmatpush.bf16.msra.mxu3 %v509_v38  ;;  %v550_v54 = vld [vmem:[#allocation8 + $0x34] sm:$0xf]  ;;  %v490_v55 = vld [vmem:[#allocation8 + $0x38] sm:$0xf0]  ;;  %v425_v57 = vor.u32 %v533_v49, %v422_v51  ;;  %v489_v58 = vor.u32 %v551_v53, %v488_v52  ;;  %v412_v59 = vld [vmem:[#allocation7 + $0x20] sm:$0xf] }
  0x23   :  { %v532_v60 = vld [vmem:[#allocation7 + $0x24] sm:$0xf0]  ;;  %v531_v61 = vld [vmem:[#allocation7 + $0x24] sm:$0xf]  ;;  %v493_v62 = vor.u32 %v550_v54, %v490_v55  ;;  %v414_v63 = vld [vmem:[#allocation7 + $0x28] sm:$0xf0] }
  0x24   :  { %200 = vmatpush.bf16.msra.mxu0 %v429_v44  ;;  %v480_v0 = vld [vmem:[#allocation8 + $0x20] sm:$0xf]  ;;  %v549_v1 = vld [vmem:[#allocation8 + $0x24] sm:$0xf0]  ;;  %v548_v2 = vld [vmem:[#allocation8 + $0x24] sm:$0xf]  ;;  %v413_v4 = vor.u32 %v532_v60, %v412_v59  ;;  %v417_v5 = vor.u32 %v531_v61, %v414_v63 }
  0x25   :  { %214 = vmatpush.bf16.msra.mxu1 %v433_v45  ;;  %v482_v3 = vld [vmem:[#allocation8 + $0x28] sm:$0xf0]  ;;  %v481_v6 = vor.u32 %v549_v1, %v480_v0  ;;  %v404_v7 = vld [vmem:[#allocation7 + $0x10] sm:$0xf]  ;;  %v530_v8 = vld [vmem:[#allocation7 + $0x14] sm:$0xf0] }
  0x26   :  { %332 = vmatpush.bf16.msra.mxu2 %v497_v46  ;;  %346 = vmatpush.bf16.msra.mxu3 %v501_v50  ;;  %v529_v9 = vld [vmem:[#allocation7 + $0x14] sm:$0xf]  ;;  %v485_v10 = vor.u32 %v548_v2, %v482_v3  ;;  %v406_v11 = vld [vmem:[#allocation7 + $0x18] sm:$0xf0]  ;;  %v472_v12 = vld [vmem:[#allocation8 + $0x10] sm:$0xf]  ;;  %v405_v16 = vor.u32 %v530_v8, %v404_v7 }
  0x27   :  { %v547_v13 = vld [vmem:[#allocation8 + $0x14] sm:$0xf0]  ;;  %v546_v14 = vld [vmem:[#allocation8 + $0x14] sm:$0xf]  ;;  %v474_v15 = vld [vmem:[#allocation8 + $0x18] sm:$0xf0]  ;;  %v409_v17 = vor.u32 %v529_v9, %v406_v11 }
  0x28   :  { %201 = vmatpush.bf16.msra.mxu0 %v421_v56  ;;  %v473_v18 = vor.u32 %v547_v13, %v472_v12  ;;  %v396_v19 = vld [vmem:[#allocation7] sm:$0xf]  ;;  %v528_v20 = vld [vmem:[#allocation7 + $0x4] sm:$0xf0]  ;;  %v527_v21 = vld [vmem:[#allocation7 + $0x4] sm:$0xf]  ;;  %v477_v22 = vor.u32 %v546_v14, %v474_v15 }
  0x29   :  { %215 = vmatpush.bf16.msra.mxu1 %v425_v57  ;;  %v398_v23 = vld [vmem:[#allocation7 + $0x8] sm:$0xf0]  ;;  %v464_v24 = vld [vmem:[#allocation8] sm:$0xf]  ;;  %v545_v25 = vld [vmem:[#allocation8 + $0x4] sm:$0xf0]  ;;  %v397_v28 = vor.u32 %v528_v20, %v396_v19 }
  0x2a   :  { %333 = vmatpush.bf16.msra.mxu2 %v489_v58  ;;  %347 = vmatpush.bf16.msra.mxu3 %v493_v62  ;;  %v544_v26 = vld [vmem:[#allocation8 + $0x4] sm:$0xf]  ;;  %v466_v27 = vld [vmem:[#allocation8 + $0x8] sm:$0xf0]  ;;  %v401_v29 = vor.u32 %v527_v21, %v398_v23  ;;  %v465_v30 = vor.u32 %v545_v25, %v464_v24  ;;  %v526_v32 = vld [vmem:[#allocation2] sm:$0xff]  ;;  %s708_s2 = smov [#allocation10]  }
  0x2b   :  { %v469_v31 = vor.u32 %v544_v26, %v466_v27  ;;  %v543_v33 = vld [vmem:[#allocation5] sm:$0xff]  ;;  %s373_s3 = sshll.u32 %s708_s2, 4  ;;  %s375_s13 = sshll.u32 %s755_s4, 4  ;;  %s374_s3 = int_to_ptr.vmem [resolvable:$true] %s373_s3  ;;  %s376_s13 = int_to_ptr.hbm [resolvable:$true] %s375_s13 }
  0x2c   :  { %202 = vmatpush.bf16.msra.mxu0 %v413_v4  ;;  %s709_s14 = smov 256   ;;  %s710_s15 = smov 16  }
  0x2d   :  { %216 = vmatpush.bf16.msra.mxu1 %v417_v5 }
  0x2e   :  { %334 = vmatpush.bf16.msra.mxu2 %v481_v6  ;;  %348 = vmatpush.bf16.msra.mxu3 %v485_v10 }
  0x30   :  { %203 = vmatpush.bf16.msra.mxu0 %v405_v16 }
  0x31   :  { %217 = vmatpush.bf16.msra.mxu1 %v409_v17 }
  0x32   :  { %335 = vmatpush.bf16.msra.mxu2 %v473_v18  ;;  %349 = vmatpush.bf16.msra.mxu3 %v477_v22 }
  0x34   :  { %204 = vmatpush.bf16.msra.mxu0 %v397_v28 }
  0x35   :  { %218 = vmatpush.bf16.msra.mxu1 %v401_v29 }
  0x36   :  { %336 = vmatpush.bf16.msra.mxu2 %v465_v30  ;;  %350 = vmatpush.bf16.msra.mxu3 %v469_v31 }
  0x37   :  { %205 = vmatmul.bf16.vlgmr.msra.gmra.mxu0 %v526_v32 }
  0x38   :  { %219 = vmatmul.bf16.vlgmr.msra.gmra.mxu1 %v526_v32 }
  0x39   :  { %337 = vmatmul.bf16.vlgmr.msra.gmra.mxu2 %v543_v33  ;;  %351 = vmatmul.bf16.vlgmr.msra.gmra.mxu3 %v543_v33 }
  0xb4   :  { %v206_v34 = vpop.f32.mrf.mxu0 }
  0xb5   :  { %v220_v35 = vpop.f32.mrf.mxu1 }
  0xbc   :  { %v338_v36 = vpop.f32.mrf.mxu2  ;;  %v352_v38 = vpop.f32.mrf.mxu3 }
  0xbd   :  { %v357_v37 = vsub.f32 %v206_v34, %v338_v36  ;;  %v358_v39 = vsub.f32 %v220_v35, %v352_v38  ;;  %v208_v40 = vpop.f32.mrf.mxu0  ;;  %v222_v42 = vpop.f32.mrf.mxu1 }
  0xbf   :  { %365 = vst [vmem:[#allocation10] sm:$0xff] %v357_v37 }
  0xc0   :  { %366 = vst [vmem:[#allocation10 + $0x8] sm:$0xff] %v358_v39 }
  0xc4   :  { %v340_v41 = vpop.f32.mrf.mxu2  ;;  %v354_v44 = vpop.f32.mrf.mxu3 }
  0xc5   :  { %v359_v43 = vsub.f32 %v208_v40, %v340_v41  ;;  %v360_v45 = vsub.f32 %v222_v42, %v354_v44 }
  0xc7   :  { %367 = vst [vmem:[#allocation10 + $0x10] sm:$0xff] %v359_v43 }
  0xc8   :  { %368 = vst [vmem:[#allocation10 + $0x18] sm:$0xff] %v360_v45 }
  0xc9   :  { %381 = dma.vmem_to_hbm [thread:$0]  %s374_s3, 512, %s376_s13, [#allocation4], %s709_s14, %s709_s14, %s710_s15  }
  0xca   :  { %698 = dma.done.wait [#allocation4], 512  }
  0xcb   :  { %699 = vsyncadd [#allocation4], 4294966784 }
  0xcc   :  { %386 = vsyncpa [#allocation3], 1 }
  0xcd   :  { %387 = vsyncpa [#allocation6], 1 }
  0xce   :  { %388 = vsyncpa [#allocation9], 1 }
  0xcf   :  { %389 = vsyncpa [#allocation4], 1 }

</bundles_post_ra>
